<compile_context>
chip_gen: v5e
topology: v5e:2x2
jax: 0.10.0
libtpu: 0.0.40
codegen_flags: <defaults>
</compile_context>

<pallas_src>
import jax
import jax.numpy as jnp
from jax.experimental import pallas as pl
from jax.experimental.pallas import tpu as pltpu

LANES = 128
SUBLANES = 8


def _round_up(x, m):
    return ((x + m - 1) // m) * m


def _margin_loss_kernel(sim_ref, diff_ref, gt_ref, out_ref):
    """Accumulate sum(|sim-gt| - |diff-gt|) for one split into out_ref."""
    i = pl.program_id(1)  # inner (reduction) axis over row tiles

    @pl.when(i == 0)
    def _():
        out_ref[...] = jnp.zeros_like(out_ref)

    gt = gt_ref[...].astype(jnp.float32)
    d = (jnp.abs(sim_ref[...].astype(jnp.float32) - gt)
         - jnp.abs(diff_ref[...].astype(jnp.float32) - gt))
    # Fold the (tile, 128) elementwise result into one (8, 128) vreg partial:
    # pure cross-vreg VPU adds; keeps the resident accumulator tiny no matter
    # how large the streaming tile is.
    out_ref[...] += jnp.sum(d.reshape(-1, SUBLANES, LANES), axis=0)[None]


def margin_loss(sim, diff, gt, *, tile_rows=2048, num_splits=2):
    assert sim.shape == diff.shape == gt.shape
    n = int(sim.size)
    assert n > 0

    rows = pl.cdiv(n, LANES)
    # Cap the tile for small inputs; keep it a multiple of the 8-row sublane.
    tile = _round_up(min(tile_rows, _round_up(rows, SUBLANES)), SUBLANES)
    # Leading "parallel" split (2 TensorCores on v7x) only if each split owns
    # at least one full tile of work.
    splits = num_splits if rows >= num_splits * tile else 1
    padded_rows = _round_up(rows, splits * tile)

    def prep(x):
        flat = jnp.ravel(x)            # keep original dtype; cast in-kernel
        pad = padded_rows * LANES - n
        if pad:                        # zero pad is consistent across inputs
            flat = jnp.pad(flat, (0, pad))
        return flat.reshape(padded_rows, LANES)

    sim2, diff2, gt2 = prep(sim), prep(diff), prep(gt)

    tiles_per_split = padded_rows // (splits * tile)
    grid = (splits, tiles_per_split)

    def in_map(s, i):
        return (s * tiles_per_split + i, 0)

    row_spec = pl.BlockSpec((tile, LANES), in_map)

    partials = pl.pallas_call(
        _margin_loss_kernel,
        out_shape=jax.ShapeDtypeStruct((splits, SUBLANES, LANES), jnp.float32),
        grid_spec=pltpu.PrefetchScalarGridSpec(
            num_scalar_prefetch=0,
            grid=grid,
            in_specs=[row_spec, row_spec, row_spec],
            out_specs=pl.BlockSpec((1, SUBLANES, LANES),
                                   lambda s, i: (s, 0, 0)),
        ),
        compiler_params=pltpu.CompilerParams(
            dimension_semantics=("parallel", "arbitrary")),
    )(sim2, diff2, gt2)

    # Tiny final combine: sum per-split (8,128) partials, scale by 1/n, relu.
    loss = jnp.sum(partials) * (1.0 / float(n))
    return jnp.maximum(loss, jnp.float32(0.0))


def margin_loss_ref(sim, diff, gt):
    loss = jnp.mean(jnp.abs(sim - gt)) - jnp.mean(jnp.abs(diff - gt))
    return jnp.maximum(loss, 0.0)


if __name__ == "__main__":
    key = jax.random.PRNGKey(0)
    k1, k2, k3 = jax.random.split(key, 3)

    # Small NCHW inputs consistent with the PyTorch module.
    shape = (2, 4, 16, 16)
    sim = jax.random.normal(k1, shape, dtype=jnp.float32)
    diff = jax.random.normal(k2, shape, dtype=jnp.float32)
    gt = jax.random.normal(k3, shape, dtype=jnp.float32)

    out = margin_loss(sim, diff, gt)
    jax.block_until_ready(out)
    ref = margin_loss_ref(sim, diff, gt)
    assert jnp.allclose(out, ref, atol=1e-5, rtol=1e-5), (out, ref)

    # Also exercise the multi-tile / two-split grid path.
    shape2 = (4, 8, 64, 64)
    sim_b = jax.random.normal(k1, shape2, dtype=jnp.float32)
    diff_b = jax.random.normal(k2, shape2, dtype=jnp.float32)
    gt_b = jax.random.normal(k3, shape2, dtype=jnp.float32)
    out_b = margin_loss(sim_b, diff_b, gt_b, tile_rows=128, num_splits=2)
    jax.block_until_ready(out_b)
    ref_b = margin_loss_ref(sim_b, diff_b, gt_b)
    assert jnp.allclose(out_b, ref_b, atol=1e-5, rtol=1e-4), (out_b, ref_b)

    print("KERNEL_OK")
</pallas_src>

<mosaic_0001>
module attributes {stable_mosaic.version = 11 : i64} {
  func.func @_margin_loss_kernel(%arg0: i32, %arg1: i32, %arg2: memref<16x128xf32, #tpu.memory_space<vmem>>, %arg3: memref<16x128xf32, #tpu.memory_space<vmem>>, %arg4: memref<16x128xf32, #tpu.memory_space<vmem>>, %arg5: memref<1x8x128xf32, #tpu.memory_space<vmem>>) attributes {dimension_semantics = [#tpu.dimension_semantics<parallel>, #tpu.dimension_semantics<arbitrary>], iteration_bounds = array<i64: 1, 1>, scalar_prefetch = 0 : i64, scratch_operands = 0 : i64, tpu.core_type = #tpu.core_type<tc>, window_params = [{transform_indices = @transform_0, window_bounds = array<i64: 16, 128>}, {transform_indices = @transform_1, window_bounds = array<i64: 16, 128>}, {transform_indices = @transform_2, window_bounds = array<i64: 16, 128>}, {transform_indices = @transform_3, window_bounds = array<i64: 1, 8, 128>}]} {
    %c0_i32 = arith.constant 0 : i32
    %0 = arith.cmpi eq, %arg1, %c0_i32 : i32
    %1 = arith.extui %0 : i1 to i32
    %c0_i32_0 = arith.constant 0 : i32
    %2 = arith.cmpi ne, %1, %c0_i32_0 : i32
    scf.if %2 {
      %cst_12 = arith.constant 0.000000e+00 : f32
      %17 = vector.broadcast %cst_12 : f32 to vector<1x8x128xf32>
      %c0_13 = arith.constant 0 : index
      %c0_14 = arith.constant 0 : index
      %c0_15 = arith.constant 0 : index
      %18 = vector.load %arg5[%c0_13, %c0_14, %c0_15] : memref<1x8x128xf32, #tpu.memory_space<vmem>>, vector<1x8x128xf32>
      tpu.vector_store %arg5[%c0_13, %c0_14, %c0_15], %17 {strides = array<i32>} : memref<1x8x128xf32, #tpu.memory_space<vmem>>, vector<1x8x128xf32>,
    } else {
    }
    %c0 = arith.constant 0 : index
    %c0_1 = arith.constant 0 : index
    %3 = vector.load %arg4[%c0, %c0_1] : memref<16x128xf32, #tpu.memory_space<vmem>>, vector<16x128xf32>
    %c0_2 = arith.constant 0 : index
    %c0_3 = arith.constant 0 : index
    %4 = vector.load %arg2[%c0_2, %c0_3] : memref<16x128xf32, #tpu.memory_space<vmem>>, vector<16x128xf32>
    %5 = arith.subf %4, %3 : vector<16x128xf32>
    %6 = math.absf %5 : vector<16x128xf32>
    %c0_4 = arith.constant 0 : index
    %c0_5 = arith.constant 0 : index
    %7 = vector.load %arg3[%c0_4, %c0_5] : memref<16x128xf32, #tpu.memory_space<vmem>>, vector<16x128xf32>
    %8 = arith.subf %7, %3 : vector<16x128xf32>
    %9 = math.absf %8 : vector<16x128xf32>
    %10 = arith.subf %6, %9 : vector<16x128xf32>
    %c0_6 = arith.constant 0 : index
    %c0_7 = arith.constant 0 : index
    %c0_8 = arith.constant 0 : index
    %11 = vector.load %arg5[%c0_6, %c0_7, %c0_8] : memref<1x8x128xf32, #tpu.memory_space<vmem>>, vector<1x8x128xf32>
    %12 = vector.shape_cast %10 : vector<16x128xf32> to vector<2x8x128xf32>
    %cst = arith.constant dense<0.000000e+00> : vector<8x128xf32>
    %13 = vector.multi_reduction <add>, %12, %cst [0] : vector<2x8x128xf32> to vector<8x128xf32>
    %14 = vector.shape_cast %13 : vector<8x128xf32> to vector<1x8x128xf32>
    %15 = arith.addf %11, %14 : vector<1x8x128xf32>
    %c0_9 = arith.constant 0 : index
    %c0_10 = arith.constant 0 : index
    %c0_11 = arith.constant 0 : index
    %16 = vector.load %arg5[%c0_9, %c0_10, %c0_11] : memref<1x8x128xf32, #tpu.memory_space<vmem>>, vector<1x8x128xf32>
    tpu.vector_store %arg5[%c0_9, %c0_10, %c0_11], %15 {strides = array<i32>} : memref<1x8x128xf32, #tpu.memory_space<vmem>>, vector<1x8x128xf32>,
    return
  }
  func.func @transform_0(%arg0: i32, %arg1: i32) -> (i32, i32) {
    %c1_i32 = arith.constant 1 : i32
    %0 = arith.muli %arg0, %c1_i32 : i32
    %1 = arith.addi %0, %arg1 : i32
    %c0_i32 = arith.constant 0 : i32
    %c0_i32_0 = arith.constant 0 : i32
    return %1, %c0_i32 : i32, i32
  }
  func.func @transform_1(%arg0: i32, %arg1: i32) -> (i32, i32) {
    %c1_i32 = arith.constant 1 : i32
    %0 = arith.muli %arg0, %c1_i32 : i32
    %1 = arith.addi %0, %arg1 : i32
    %c0_i32 = arith.constant 0 : i32
    %c0_i32_0 = arith.constant 0 : i32
    return %1, %c0_i32 : i32, i32
  }
  func.func @transform_2(%arg0: i32, %arg1: i32) -> (i32, i32) {
    %c1_i32 = arith.constant 1 : i32
    %0 = arith.muli %arg0, %c1_i32 : i32
    %1 = arith.addi %0, %arg1 : i32
    %c0_i32 = arith.constant 0 : i32
    %c0_i32_0 = arith.constant 0 : i32
    return %1, %c0_i32 : i32, i32
  }
  func.func @transform_3(%arg0: i32, %arg1: i32) -> (i32, i32, i32) {
    %c0_i32 = arith.constant 0 : i32
    %c0_i32_0 = arith.constant 0 : i32
    %c0_i32_1 = arith.constant 0 : i32
    return %arg0, %c0_i32, %c0_i32_0 : i32, i32, i32
  }
}

</mosaic_0001>

<bundles_post_ra>
// kernel: tpu_custom_call.1
= control target key start
LH: loop header
LB: loop body
LE: loop exit
PB: predicated region body
PF: predicated region fallthrough
CT: control target
= control target key end

     0   :  { %8 = vsyncpa [#allocation3], 0  ;;  %s270_s0 = inlined_call_operand.hbm [shape: f32[16,128], index: 0, kind: input, shape index: {}]   ;;  %s271_s1 = inlined_call_operand.hbm [shape: f32[16,128], index: 1, kind: input, shape index: {}]   ;;  %s272_s2 = inlined_call_operand.hbm [shape: f32[16,128], index: 2, kind: input, shape index: {}]   ;;  %s273_s3 = inlined_call_operand.hbm [shape: f32[1,8,128], index: 3, kind: output, shape index: {}]  }
   0x1   :  { %9 = vsyncpa [#allocation6], 0 }
   0x2   :  { %10 = vsyncpa [#allocation4], 0  ;;  %s36_s14 = sshll.u32 %s271_s1, 4  ;;  %s232_s15 = smov [#allocation5]   ;;  %s37_s14 = int_to_ptr.hbm [resolvable:$true] %s36_s14 }
   0x3   :  { %s38_s16 = sshll.u32 %s232_s15, 4  ;;  %s19_s19 = sshll.u32 %s270_s0, 4  ;;  %s39_s16 = int_to_ptr.vmem [resolvable:$true] %s38_s16  ;;  %s20_s19 = int_to_ptr.hbm [resolvable:$true] %s19_s19 }
   0x4   :  { %s233_s20 = smov 128   ;;  %s234_s21 = smov 8  }
   0x5   :  { %44 = dma.hbm_to_vmem [thread:$0]  %s37_s14, 256, %s39_s16, [#allocation6], %s233_s20, %s233_s20, %s234_s21  }
   0x6   :  { %s235_s22 = smov [#allocation2]   ;;  %s53_s26 = sshll.u32 %s272_s2, 4  ;;  %s54_s26 = int_to_ptr.hbm [resolvable:$true] %s53_s26 }
   0x7   :  { %s21_s23 = sshll.u32 %s235_s22, 4  ;;  %s236_s1 = smov [#allocation7]   ;;  %s22_s23 = int_to_ptr.vmem [resolvable:$true] %s21_s23 }
   0x8   :  { %27 = dma.hbm_to_vmem [thread:$0]  %s20_s19, 256, %s22_s23, [#allocation3], %s233_s20, %s233_s20, %s234_s21  }
   0x9   :  { %s55_s27 = sshll.u32 %s236_s1, 4  ;;  %s56_s27 = int_to_ptr.vmem [resolvable:$true] %s55_s27 }
   0xa   :  { %61 = dma.hbm_to_vmem [thread:$0]  %s54_s26, 256, %s56_s27, [#allocation6], %s233_s20, %s233_s20, %s234_s21  }
   0xb   :  { %226 = dma.done.wait [#allocation3], 256  }
   0xc   :  { %227 = vsyncadd [#allocation3], 4294967040 }
   0xd   :  { %228 = dma.done.wait [#allocation6], 512  }
   0xe   :  { %229 = vsyncadd [#allocation6], 4294966784  ;;  %v85_v0 = vld [vmem:[#allocation7] sm:$0xff]  ;;  %v86_v1 = vld [vmem:[#allocation7 + $0x8] sm:$0xff]  ;;  %s237_s0 = smov [#allocation8]   ;;  %s112_s30 = sshll.u32 %s273_s3, 4  ;;  %s113_s30 = int_to_ptr.hbm [resolvable:$true] %s112_s30 }
   0xf   :  { %v87_v2 = vld [vmem:[#allocation2] sm:$0xff]  ;;  %v88_v3 = vld [vmem:[#allocation2 + $0x8] sm:$0xff]  ;;  %v93_v5 = vld [vmem:[#allocation5] sm:$0xff]  ;;  %s110_s2 = sshll.u32 %s237_s0, 4  ;;  %s111_s2 = int_to_ptr.vmem [resolvable:$true] %s110_s2 }
  0x10   :  { %v89_v4 = vsub.f32 %v87_v2, %v85_v0  ;;  %v94_v6 = vld [vmem:[#allocation5 + $0x8] sm:$0xff]  ;;  %v90_v7 = vsub.f32 %v88_v3, %v86_v1  ;;  %v95_v8 = vsub.f32 %v93_v5, %v85_v0 }
  0x11   :  { %v96_v9 = vsub.f32 %v94_v6, %v86_v1 }
  0x12   :  { %v91_v10 = vand.u32 2147483647, %v89_v4  ;;  %v92_v11 = vand.u32 2147483647, %v90_v7  ;;  %v97_v12 = vand.u32 2147483647, %v95_v8 }
  0x13   :  { %v98_v13 = vand.u32 2147483647, %v96_v9 }
  0x14   :  { %v99_v14 = vsub.f32 %v91_v10, %v97_v12 }
  0x15   :  { %v100_v15 = vsub.f32 %v92_v11, %v98_v13 }
  0x17   :  { %v102_v16 = vadd.f32 %v100_v15, %v99_v14 }
  0x19   :  { %104 = vst [vmem:[#allocation8] sm:$0xff] %v102_v16 }
  0x1a   :  { %115 = dma.vmem_to_hbm [thread:$0]  %s111_s2, 128, %s113_s30, [#allocation4]  }
  0x1b   :  { %230 = dma.done.wait [#allocation4], 128  }
  0x1c   :  { %231 = vsyncadd [#allocation4], 4294967168 }
  0x1d   :  { %120 = vsyncpa [#allocation3], 1 }
  0x1e   :  { %121 = vsyncpa [#allocation6], 1 }
  0x1f   :  { %122 = vsyncpa [#allocation4], 1 }

</bundles_post_ra>
